<compile_context>
chip_gen: v6e
topology: v6e:2x2x1
jax: 0.10.0
libtpu: 0.0.40
codegen_flags: <defaults>
</compile_context>

<pallas_src>
import numpy as np

import jax
import jax.numpy as jnp
from jax.experimental import pallas as pl
from jax.experimental.pallas import tpu as pltpu


def _attention_kernel(g_ref, x_ref, wg_ref, wx_ref, bgx_ref, wp_ref, bp_ref,
                      o_ref):
    # g_ref: (F_g, TP), x_ref: (F_l, TP) -- channels on sublanes, pixels on lanes.
    g1 = jnp.dot(wg_ref[...], g_ref[...],
                 preferred_element_type=jnp.float32)            # (F_int, TP)
    x1 = jnp.dot(wx_ref[...], x_ref[...],
                 preferred_element_type=jnp.float32)            # (F_int, TP)
    a = jnp.maximum(g1 + x1 + bgx_ref[...], 0.0)                # ReLU, f32
    # psi projection (F_int -> 1) as VPU FMA + sublane (XLU) reduce: skips MXU.
    p = jnp.sum(wp_ref[...] * a, axis=0, keepdims=True) + bp_ref[...]   # (1, TP)
    psi = jax.nn.sigmoid(p)                                     # (1, TP), f32
    o_ref[...] = (x_ref[...].astype(jnp.float32) * psi).astype(o_ref.dtype)


def _fold_bn(w, b, gamma, beta, mean, var, eps=1e-5):
    """Fold eval-mode BatchNorm into a 1x1 conv.  w: (C_out, C_in), b: (C_out,)."""
    scale = gamma / jnp.sqrt(var + eps)
    w_eff = w * scale[:, None]
    b_eff = (b - mean) * scale + beta
    return w_eff, b_eff


def _prep_params(params, stream_dtype):
    """Fold BN (eval mode) into the 1x1 convs and cast matmul weights."""
    wg, bg = _fold_bn(params["wg"], params["bg"], params["bn_g_gamma"],
                      params["bn_g_beta"], params["bn_g_mean"], params["bn_g_var"])
    wx, bx = _fold_bn(params["wx"], params["bx"], params["bn_x_gamma"],
                      params["bn_x_beta"], params["bn_x_mean"], params["bn_x_var"])
    wp, bp = _fold_bn(params["wp"], params["bp"], params["bn_p_gamma"],
                      params["bn_p_beta"], params["bn_p_mean"], params["bn_p_var"])
    F_int = wg.shape[0]
    wg_m = wg.astype(stream_dtype)                      # (F_int, F_g)
    wx_m = wx.astype(stream_dtype)                      # (F_int, F_l)
    bgx = (bg + bx).reshape(F_int, 1).astype(jnp.float32)
    wp_m = jnp.transpose(wp).astype(jnp.float32)        # (F_int, 1)
    bp_m = bp.reshape(1, 1).astype(jnp.float32)
    return wg_m, wx_m, bgx, wp_m, bp_m


def _vmem_capacity_bytes():
    try:
        return int(pltpu.get_tpu_info().vmem_capacity_bytes)
    except Exception:
        return 64 * 1024 * 1024  # conservative (v7x per-TC VMEM)


def _round_up(v, m):
    return ((v + m - 1) // m) * m


def _pick_tile(HW, N, F_g, F_l, F_int, in_isz, out_isz, vmem_cap, tile_p):
    # HBM traffic per pixel per grid step (stream g, x + write out).
    hbm_per_px = in_isz * (F_g + F_l) + out_isz * F_l
    # ~2 MiB of HBM traffic per step amortizes the ~0.35us fixed per-step cost.
    tp_bw = max(128, (2 * 1024 * 1024) // hbm_per_px // 128 * 128)
    # VMEM per pixel: double-buffered g/x/out blocks + f32 intermediates.
    vmem_per_px = 2 * in_isz * (F_g + F_l) + 2 * out_isz * F_l + 4 * 4 * F_int
    tp_vmem = max(128, int(0.6 * vmem_cap) // vmem_per_px // 128 * 128)
    # Keep >= ~8 total grid steps when the data allows (v7x 2 TCs + pipelining).
    desired_steps = max(1, -(-8 // N))
    tp_steps = max(128, _round_up(-(-HW // desired_steps), 128))
    tp = _round_up(tile_p, 128) if tile_p is not None else min(tp_bw, tp_steps)
    tp = max(128, min(tp, tp_vmem, _round_up(HW, 128)))
    return tp


def attention_block(g, x, params, *, tile_p=None, stream_dtype=jnp.bfloat16,
                    out_dtype=None):
    """g: (N, F_g, H, W), x: (N, F_l, H, W) in NCHW (PyTorch convention)."""
    N, F_g, H, W = g.shape
    Nx, F_l, Hx, Wx = x.shape
    assert (N, H, W) == (Nx, Hx, Wx)
    F_int = params["wg"].shape[0]
    HW = H * W
    out_dtype = x.dtype if out_dtype is None else out_dtype

    wg_m, wx_m, bgx, wp_m, bp_m = _prep_params(params, stream_dtype)

    # NCHW consumed directly as (N, C, HW): no transpose, lane-dense pixel axis.
    # (In a real network the producer would already emit stream_dtype; the cast
    #  here is wrapper-side and expected to fuse upstream.)
    g_r = g.reshape(N, F_g, HW).astype(stream_dtype)
    x_r = x.reshape(N, F_l, HW).astype(stream_dtype)

    in_isz = np.dtype(stream_dtype).itemsize
    out_isz = np.dtype(out_dtype).itemsize
    vmem_cap = _vmem_capacity_bytes()
    tp = _pick_tile(HW, N, F_g, F_l, F_int, in_isz, out_isz, vmem_cap, tile_p)

    # Ragged final pixel block handled by Pallas: no host-side pad / slice pass.
    grid = (N, pl.cdiv(HW, tp))
    w_map = lambda n, p: (0, 0)      # weights/biases: same block every step
    px_map = lambda n, p: (n, 0, p)  # (batch, channel, pixel-tile)

    # Advisory cost hint: mem-bound 1x1-conv attention gate.
    weight_bytes = int((wg_m.size + wx_m.size) * in_isz
                       + (bgx.size + wp_m.size + bp_m.size) * 4)
    flops = int(2 * N * HW * F_int * (F_g + F_l)      # two channel matmuls
                + 5 * N * HW * F_int                   # add/relu/psi-FMA/reduce
                + 2 * N * HW * F_l)                    # x * psi
    bytes_accessed = int(N * HW * (in_isz * (F_g + F_l) + out_isz * F_l)
                         + weight_bytes)
    cost = pl.CostEstimate(flops=flops, transcendentals=int(N * HW),
                           bytes_accessed=bytes_accessed)

    # Explicit VMEM budget (scoped defaults are 16/32 MiB; v7x physical 64 MiB).
    vmem_per_px = 2 * in_isz * (F_g + F_l) + 2 * out_isz * F_l + 4 * 4 * F_int
    est_vmem = tp * vmem_per_px + 2 * weight_bytes + (4 << 20)
    vmem_limit = int(min(max(est_vmem, 32 << 20), int(0.9 * vmem_cap)))

    out_flat = pl.pallas_call(
        _attention_kernel,
        out_shape=jax.ShapeDtypeStruct((N, F_l, HW), out_dtype),
        grid_spec=pltpu.PrefetchScalarGridSpec(
            num_scalar_prefetch=0,
            grid=grid,
            in_specs=[
                pl.BlockSpec((None, F_g, tp), px_map),   # g   (batch squeezed)
                pl.BlockSpec((None, F_l, tp), px_map),   # x
                pl.BlockSpec((F_int, F_g), w_map),       # Wg (bf16)
                pl.BlockSpec((F_int, F_l), w_map),       # Wx (bf16)
                pl.BlockSpec((F_int, 1), w_map),         # bg+bx (f32)
                pl.BlockSpec((F_int, 1), w_map),         # Wpsi column (f32)
                pl.BlockSpec((1, 1), w_map),             # bpsi (f32)
            ],
            out_specs=pl.BlockSpec((None, F_l, tp), px_map),
        ),
        compiler_params=pltpu.CompilerParams(
            dimension_semantics=("parallel", "parallel"),
            vmem_limit_bytes=vmem_limit),
        cost_estimate=cost,
    )(g_r, x_r, wg_m, wx_m, bgx, wp_m, bp_m)

    # (N, F_l, HW) -> NCHW (pure reshape, no transpose, no slice).
    return out_flat.reshape(N, F_l, H, W)


def init_params(key, F_g, F_l, F_int):
    ks = jax.random.split(key, 6)
    return {
        # 1x1 conv weights stored as (C_out, C_in) (kernel spatial dims are 1).
        "wg": 0.1 * jax.random.normal(ks[0], (F_int, F_g), jnp.float32),
        "bg": 0.05 * jax.random.normal(ks[1], (F_int,), jnp.float32),
        "wx": 0.1 * jax.random.normal(ks[2], (F_int, F_l), jnp.float32),
        "bx": 0.05 * jax.random.normal(ks[3], (F_int,), jnp.float32),
        "wp": 0.1 * jax.random.normal(ks[4], (1, F_int), jnp.float32),
        "bp": 0.05 * jax.random.normal(ks[5], (1,), jnp.float32),
        # BatchNorm (eval mode) params / running stats.
        "bn_g_gamma": jnp.ones((F_int,), jnp.float32),
        "bn_g_beta": jnp.zeros((F_int,), jnp.float32),
        "bn_g_mean": jnp.zeros((F_int,), jnp.float32),
        "bn_g_var": jnp.ones((F_int,), jnp.float32),
        "bn_x_gamma": jnp.ones((F_int,), jnp.float32),
        "bn_x_beta": jnp.zeros((F_int,), jnp.float32),
        "bn_x_mean": jnp.zeros((F_int,), jnp.float32),
        "bn_x_var": jnp.ones((F_int,), jnp.float32),
        "bn_p_gamma": jnp.ones((1,), jnp.float32),
        "bn_p_beta": jnp.zeros((1,), jnp.float32),
        "bn_p_mean": jnp.zeros((1,), jnp.float32),
        "bn_p_var": jnp.ones((1,), jnp.float32),
    }


def _reference(g, x, params, stream_dtype=jnp.bfloat16):
    """Pure-JAX reference of the same forward (eval-mode BN, same bf16 rounding)."""
    wg_m, wx_m, bgx, wp_m, bp_m = _prep_params(params, stream_dtype)
    gf = g.astype(stream_dtype).astype(jnp.float32)
    xf = x.astype(stream_dtype).astype(jnp.float32)
    wg = wg_m.astype(jnp.float32)
    wx = wx_m.astype(jnp.float32)
    g1 = jnp.einsum("oc,nchw->nohw", wg, gf)
    x1 = jnp.einsum("oc,nchw->nohw", wx, xf)
    a = jnp.maximum(g1 + x1 + bgx.reshape(1, -1, 1, 1), 0.0)
    p = jnp.einsum("co,nchw->nohw", wp_m, a) + bp_m.reshape(1, 1, 1, 1)
    psi = jax.nn.sigmoid(p)
    return (xf * psi).astype(x.dtype)


if __name__ == "__main__":
    # Shapes implied by the module: g:(N,F_g,H,W), x:(N,F_l,H,W), same H,W.
    N, F_g, F_l, F_int, H, W = 2, 8, 8, 16, 16, 16
    key = jax.random.PRNGKey(0)
    kg, kx, kp = jax.random.split(key, 3)
    g = jax.random.normal(kg, (N, F_g, H, W), jnp.float32)
    x = jax.random.normal(kx, (N, F_l, H, W), jnp.float32)
    params = init_params(kp, F_g, F_l, F_int)

    out = jax.block_until_ready(attention_block(g, x, params))
    ref = _reference(g, x, params)

    assert out.shape == (N, F_l, H, W)
    assert out.dtype == x.dtype
    err = float(jnp.max(jnp.abs(out.astype(jnp.float32) - ref.astype(jnp.float32))))
    assert err < 2e-3, f"max abs err {err}"
    print("KERNEL_OK")
</pallas_src>

<mosaic_0001>
module attributes {stable_mosaic.version = 11 : i64} {
  func.func @_attention_kernel(%arg0: i32, %arg1: i32, %arg2: memref<1x8x128xbf16, #tpu.memory_space<vmem>>, %arg3: memref<1x8x128xbf16, #tpu.memory_space<vmem>>, %arg4: memref<16x8xbf16, #tpu.memory_space<vmem>>, %arg5: memref<16x8xbf16, #tpu.memory_space<vmem>>, %arg6: memref<16x1xf32, #tpu.memory_space<vmem>>, %arg7: memref<16x1xf32, #tpu.memory_space<vmem>>, %arg8: memref<1x1xf32, #tpu.memory_space<vmem>>, %arg9: memref<1x8x128xf32, #tpu.memory_space<vmem>>) attributes {dimension_semantics = [#tpu.dimension_semantics<parallel>, #tpu.dimension_semantics<parallel>], iteration_bounds = array<i64: 2, 2>, scalar_prefetch = 0 : i64, scratch_operands = 0 : i64, tpu.core_type = #tpu.core_type<tc>, window_params = [{transform_indices = @transform_0, window_bounds = array<i64: 1, 8, 128>}, {transform_indices = @transform_1, window_bounds = array<i64: 1, 8, 128>}, {pipeline_mode = #tpu.pipeline_mode<synchronous>, transform_indices = @transform_2, window_bounds = array<i64: 16, 8>}, {pipeline_mode = #tpu.pipeline_mode<synchronous>, transform_indices = @transform_3, window_bounds = array<i64: 16, 8>}, {pipeline_mode = #tpu.pipeline_mode<synchronous>, transform_indices = @transform_4, window_bounds = array<i64: 16, 1>}, {pipeline_mode = #tpu.pipeline_mode<synchronous>, transform_indices = @transform_5, window_bounds = array<i64: 16, 1>}, {pipeline_mode = #tpu.pipeline_mode<synchronous>, transform_indices = @transform_6, window_bounds = array<i64: 1, 1>}, {transform_indices = @transform_7, window_bounds = array<i64: 1, 8, 128>}]} {
    %c0 = arith.constant 0 : index
    %c0_0 = arith.constant 0 : index
    %0 = vector.load %arg4[%c0, %c0_0] : memref<16x8xbf16, #tpu.memory_space<vmem>>, vector<16x8xbf16>
    %c0_1 = arith.constant 0 : index
    %c0_2 = arith.constant 0 : index
    %c0_3 = arith.constant 0 : index
    %1 = vector.load %arg2[%c0_1, %c0_2, %c0_3] : memref<1x8x128xbf16, #tpu.memory_space<vmem>>, vector<1x8x128xbf16>
    %2 = vector.shape_cast %1 : vector<1x8x128xbf16> to vector<8x128xbf16>
    %cst = arith.constant dense<0.000000e+00> : vector<16x128xf32>
    %3 = tpu.matmul %0, %2, %cst {dimension_numbers = #tpu.dot_dimension_numbers<[1], [0], [0], [1], [0, 0, 1, 1], [], []>} : vector<16x8xbf16>, vector<8x128xbf16>, vector<16x128xf32> -> vector<16x128xf32>
    %c0_4 = arith.constant 0 : index
    %c0_5 = arith.constant 0 : index
    %4 = vector.load %arg5[%c0_4, %c0_5] : memref<16x8xbf16, #tpu.memory_space<vmem>>, vector<16x8xbf16>
    %c0_6 = arith.constant 0 : index
    %c0_7 = arith.constant 0 : index
    %c0_8 = arith.constant 0 : index
    %5 = vector.load %arg3[%c0_6, %c0_7, %c0_8] : memref<1x8x128xbf16, #tpu.memory_space<vmem>>, vector<1x8x128xbf16>
    %6 = vector.shape_cast %5 : vector<1x8x128xbf16> to vector<8x128xbf16>
    %cst_9 = arith.constant dense<0.000000e+00> : vector<16x128xf32>
    %7 = tpu.matmul %4, %6, %cst_9 {dimension_numbers = #tpu.dot_dimension_numbers<[1], [0], [0], [1], [0, 0, 1, 1], [], []>} : vector<16x8xbf16>, vector<8x128xbf16>, vector<16x128xf32> -> vector<16x128xf32>
    %8 = arith.addf %3, %7 : vector<16x128xf32>
    %c0_10 = arith.constant 0 : index
    %c0_11 = arith.constant 0 : index
    %9 = vector.load %arg6[%c0_10, %c0_11] : memref<16x1xf32, #tpu.memory_space<vmem>>, vector<16x1xf32>
    %10 = vector.broadcast %9 : vector<16x1xf32> to vector<16x128xf32>
    %11 = arith.addf %8, %10 : vector<16x128xf32>
    %cst_12 = arith.constant 0.000000e+00 : f32
    %12 = vector.broadcast %cst_12 : f32 to vector<16x128xf32>
    %13 = arith.maximumf %11, %12 : vector<16x128xf32>
    %c0_13 = arith.constant 0 : index
    %c0_14 = arith.constant 0 : index
    %14 = vector.load %arg7[%c0_13, %c0_14] : memref<16x1xf32, #tpu.memory_space<vmem>>, vector<16x1xf32>
    %15 = vector.broadcast %14 : vector<16x1xf32> to vector<16x128xf32>
    %16 = arith.mulf %15, %13 : vector<16x128xf32>
    %cst_15 = arith.constant dense<0.000000e+00> : vector<128xf32>
    %17 = vector.multi_reduction <add>, %16, %cst_15 [0] : vector<16x128xf32> to vector<128xf32>
    %18 = vector.shape_cast %17 : vector<128xf32> to vector<1x128xf32>
    %c0_16 = arith.constant 0 : index
    %c0_17 = arith.constant 0 : index
    %19 = vector.load %arg8[%c0_16, %c0_17] : memref<1x1xf32, #tpu.memory_space<vmem>>, vector<1x1xf32>
    %20 = vector.broadcast %19 : vector<1x1xf32> to vector<1x128xf32>
    %21 = arith.addf %18, %20 : vector<1x128xf32>
    %22 = arith.negf %21 : vector<1x128xf32>
    %23 = math.exp %22 : vector<1x128xf32>
    %cst_18 = arith.constant 1.000000e+00 : f32
    %24 = vector.broadcast %cst_18 : f32 to vector<1x128xf32>
    %25 = arith.addf %24, %23 : vector<1x128xf32>
    %26 = arith.divf %24, %25 : vector<1x128xf32>
    %c0_19 = arith.constant 0 : index
    %c0_20 = arith.constant 0 : index
    %c0_21 = arith.constant 0 : index
    %27 = vector.load %arg3[%c0_19, %c0_20, %c0_21] : memref<1x8x128xbf16, #tpu.memory_space<vmem>>, vector<1x8x128xbf16>
    %28 = vector.shape_cast %27 : vector<1x8x128xbf16> to vector<8x128xbf16>
    %29 = arith.extf %28 : vector<8x128xbf16> to vector<8x128xf32>
    %30 = vector.broadcast %26 : vector<1x128xf32> to vector<8x128xf32>
    %31 = arith.mulf %29, %30 : vector<8x128xf32>
    %c0_22 = arith.constant 0 : index
    %c0_23 = arith.constant 0 : index
    %c0_24 = arith.constant 0 : index
    %32 = vector.load %arg9[%c0_22, %c0_23, %c0_24] : memref<1x8x128xf32, #tpu.memory_space<vmem>>, vector<1x8x128xf32>
    %33 = vector.shape_cast %32 : vector<1x8x128xf32> to vector<8x128xf32>
    %34 = vector.shape_cast %31 : vector<8x128xf32> to vector<1x8x128xf32>
    tpu.vector_store %arg9[%c0_22, %c0_23, %c0_24], %34 {strides = array<i32>} : memref<1x8x128xf32, #tpu.memory_space<vmem>>, vector<1x8x128xf32>,
    return
  }
  func.func @transform_0(%arg0: i32, %arg1: i32) -> (i32, i32, i32) {
    %c0_i32 = arith.constant 0 : i32
    %c0_i32_0 = arith.constant 0 : i32
    return %arg0, %c0_i32, %arg1 : i32, i32, i32
  }
  func.func @transform_1(%arg0: i32, %arg1: i32) -> (i32, i32, i32) {
    %c0_i32 = arith.constant 0 : i32
    %c0_i32_0 = arith.constant 0 : i32
    return %arg0, %c0_i32, %arg1 : i32, i32, i32
  }
  func.func @transform_2(%arg0: i32, %arg1: i32) -> (i32, i32) {
    %c0_i32 = arith.constant 0 : i32
    %c0_i32_0 = arith.constant 0 : i32
    %c0_i32_1 = arith.constant 0 : i32
    return %c0_i32, %c0_i32_0 : i32, i32
  }
  func.func @transform_3(%arg0: i32, %arg1: i32) -> (i32, i32) {
    %c0_i32 = arith.constant 0 : i32
    %c0_i32_0 = arith.constant 0 : i32
    %c0_i32_1 = arith.constant 0 : i32
    return %c0_i32, %c0_i32_0 : i32, i32
  }
  func.func @transform_4(%arg0: i32, %arg1: i32) -> (i32, i32) {
    %c0_i32 = arith.constant 0 : i32
    %c0_i32_0 = arith.constant 0 : i32
    %c0_i32_1 = arith.constant 0 : i32
    return %c0_i32, %c0_i32_0 : i32, i32
  }
  func.func @transform_5(%arg0: i32, %arg1: i32) -> (i32, i32) {
    %c0_i32 = arith.constant 0 : i32
    %c0_i32_0 = arith.constant 0 : i32
    %c0_i32_1 = arith.constant 0 : i32
    return %c0_i32, %c0_i32_0 : i32, i32
  }
  func.func @transform_6(%arg0: i32, %arg1: i32) -> (i32, i32) {
    %c0_i32 = arith.constant 0 : i32
    %c0_i32_0 = arith.constant 0 : i32
    %c0_i32_1 = arith.constant 0 : i32
    return %c0_i32, %c0_i32_0 : i32, i32
  }
  func.func @transform_7(%arg0: i32, %arg1: i32) -> (i32, i32, i32) {
    %c0_i32 = arith.constant 0 : i32
    %c0_i32_0 = arith.constant 0 : i32
    return %arg0, %c0_i32, %arg1 : i32, i32, i32
  }
}

</mosaic_0001>

<bundles_post_ra>
// kernel: tpu_custom_call.1
= control target key start
LH: loop header
LB: loop body
LE: loop exit
PB: predicated region body
PF: predicated region fallthrough
CT: control target
= control target key end

     0   :  { %s1025_s0 = inlined_call_operand.vmem [shape: bf16[2,8,256], index: 0, kind: input, shape index: {}]   ;;  %s1026_s1 = inlined_call_operand.vmem [shape: bf16[2,8,256], index: 1, kind: input, shape index: {}]   ;;  %s1027_s2 = inlined_call_operand.vmem [shape: bf16[16,8], index: 2, kind: input, shape index: {}]   ;;  %s1028_s3 = inlined_call_operand.vmem [shape: bf16[16,8], index: 3, kind: input, shape index: {}]   ;;  %s1029_s4 = inlined_call_operand.vmem [shape: f32[16,1], index: 4, kind: input, shape index: {}]   ;;  %s1030_s5 = inlined_call_operand.vmem [shape: f32[16,1], index: 5, kind: input, shape index: {}]   ;;  %s1031_s6 = inlined_call_operand.<no memory space> [shape: f32[1,1], index: 6, kind: input, shape index: {}]   ;;  %s1032_s7 = inlined_call_operand.hbm [shape: f32[2,8,256], index: 7, kind: output, shape index: {}]  }
   0x1   :  { %v12_v0 = vstv %s1031_s6 }
   0x2   :  { %13 = vst [vmem:[#allocation2] sm:$0x1] %v12_v0 }
   0x3   :  { %14 = vsyncpa [#allocation4], 0 }
   0x4   :  { %16 = vsyncpa [#allocation4 + $0x1], 0  ;;  %s876_s26 = smov 0   ;;  %s878_s27 = smov 0  }
   0x5   :  { %s880_s28 = smov 0   ;;  %s882_s29 = smov 0  }
   0x6   :  { %s884_s30 = smov 0   ;;  %s886_s8 = smov 0  }
   0x7   :  { %s888_s9 = smov 0   ;;  %s890_s10 = smov 0  }
   0x8 LB: > { %1036 = sst [smem:[#allocation6_spill]] %s823_s9  ;;  %s617_s6 = sadd.s32 4294967295, %s827_s10   ;;  %s827_s10 = sphi %s890_s10, %s22_s10   ;;  %s823_s9 = sphi %s888_s9, %s1043_s9   ;;  %s819_s8 = sphi %s886_s8, %s1048_s8   ;;  %s815_s30 = sphi %s884_s30, %s1041_s30   ;;  %s811_s29 = sphi %s882_s29, %s1047_s29   ;;  %s807_s28 = sphi %s880_s28, %s1046_s28   ;;  %s803_s27 = sphi %s878_s27, %s1045_s27   ;;  %s799_s26 = sphi %s876_s26, %s1044_s26  }
   0x9   : > { %s618_s11 = sadd.s32 4294967294, %s827_s10   ;;  %s31_s12 = sadd.s32 1, %s819_s8 }
   0xa   : > { %p32_p0 = scmp.ge.s32.totalorder %s31_s12, 2  ;;  %s34_s13 = sadd.s32 1, %s823_s9 }
   0xb   : > { %p214_p1 = scmp.ne.s32.totalorder %s807_s28, %s803_s27  ;;  %p215_p2 = scmp.eq.s32.totalorder %s617_s6, 3 }
   0xc   : > { %s1050_s12 = smov (%p32_p0, %s31_s12), 0  ;;  %s1052_s13 = smov (!%p32_p0, %s34_s13), %s823_s9 }
   0xd   : > { %1037 = sst [smem:[#allocation7_spill]] %s1050_s12  ;;  %s200_s14 = ssub.s32 %s819_s8, %s1050_s12 }
   0xe   : > { %p927_p3 = por %p215_p2, %p214_p1  ;;  %p36_p4 = scmp.ge.s32.totalorder %s1052_s13, 2 }
   0xf   : > { %p220_p5 = scmp.ne.s32.totalorder %s803_s27, %s799_s26  ;;  %p221_p6 = scmp.eq.s32.totalorder %s618_s11, 3 }
  0x10   : > { %p621_p7 = scmp.ge.s32.totalorder %s827_s10, 1  ;;  %s1054_s13 = smov (%p36_p4, %s1052_s13), 0 }
  0x11   : > { %1039 = sst [smem:[#allocation8_spill]] %s1054_s13  ;;  %p936_p8 = por %p221_p6, %p220_p5 }
  0x12   : > { %p276_p9 = scmp.lt.s32.totalorder %s827_s10, 5  ;;  %s199_s17 = ssub.s32 %s823_s9, %s1054_s13 }
  0x13   : > { %s204_s18 = sadd.s32 1, %s807_s28  ;;  %s201_s19 = sor.u32 %s200_s14, %s199_s17 }
  0x14   : > { %p277_p10 = pnand %p621_p7, %p276_p9  ;;  %p202_p11 = scmp.eq.s32.totalorder %s201_s19, 0 }
  0x15   : > { %p319_p12 = scmp.lt.s32.totalorder (!%p277_p10), %s815_s30, 1  ;;  %p321_p13 = scmp.lt.s32.totalorder (!%p277_p10), %s811_s29, 1 }
  0x16   : > { %s945_s20 = scalar_select %p202_p11, %s807_s28, %s204_s18  }
  0x17   : > { %280 = sbr.rel (%p277_p10) target bundleno = 309 (0x135), region = 48  ;;  %s633_s17 = sshll.u32 (!%p277_p10), %s815_s30, 1 }
  0x18   : > { %s517_s18 = sadd.s32 (!%p277_p10), %s811_s29, %s633_s17 }
  0x19   : > { %s634_s19 = sshll.u32 (!%p277_p10), %s517_s18, 7 }
  0x1c   : > { %v829_v1 = vmov 0.0   ;;  %s320_s21 = scalar_select %p319_p12, %s815_s30, 1  ;;  %vm830_vm0 = vmmov 0   ;;  %v831_v2 = vmov 0   ;;  %v448_v3 = vld [vmem:[%s1029_s4] sm:$0xff]  ;;  %v449_v5 = vld [vmem:[%s1029_s4 + $0x8] sm:$0xff]  ;;  %v491_v34 = vlaneseq }
  0x1d   : > { %641 = vmatprep.subr.bf16.mxu0 %v829_v1  ;;  %647 = vmatprep.subr.bf16.mxu1 %v829_v1  ;;  %s322_s22 = scalar_select %p321_p13, %s811_s29, 1  ;;  %v464_v4 = vld [vmem:[%s1030_s5] sm:$0xff]  ;;  %v465_v6 = vld [vmem:[%s1030_s5 + $0x8] sm:$0xff]  ;;  %vm351_vm1 = vcmask 1043456   ;;  %vm347_vm2 = vcmask 64512  }
  0x1e   : > { %643 = vmatprep.mubr.msk.bf16.mxu0 %vm830_vm0, %v829_v1  ;;  %649 = vmatprep.mubr.msk.bf16.mxu1 %vm830_vm0, %v829_v1  ;;  %s623_s11 = sshll.u32 %s320_s21, 1  ;;  %v729_v11 = vld [vmem:[%s1028_s3] sm:$0xff]   ;;  %v492_v37 = vshrl.u32 %v491_v34, 7  ;;  %s832_s29 = smov [#allocation3]  }
  0x1f   : > { %727 = vset.pattern.permute.xlu0 %v831_v2  ;;  %728 = vset.pattern.permute.xlu1 %v831_v2  ;;  %s324_s14 = sadd.s32 %s623_s11, %s322_s22  ;;  %v730_v12 = vld [vmem:[%s1027_s2] sm:$0xff]   ;;  %s739_s30 = sshll.u32 %s832_s29, 4  ;;  %s740_s30 = int_to_ptr.vmem [resolvable:$false] %s739_s30 }
  0x20   : > { %452 = vperm.xlu0 %727, %v448_v3   ;;  %468 = vperm.xlu1 %728, %v464_v4   ;;  %s624_s12 = sshll.u32 %s324_s14, 2  ;;  %v485_v13 = vld [vmem:[#allocation2] sm:$0x1]  ;;  %v493_v40 = vsub.s32 0, %v492_v37  ;;  %s741_s11 = scalar_lea.vmem %s740_s30, 256 }
  0x21   : > { %s334_s9 = scalar_lea.vmem %s1026_s1, %s624_s12  ;;  %s326_s21 = scalar_lea.vmem %s1025_s0, %s624_s12 }
  0x22   : > { %v969_v7 = vld [vmem:[%s334_s9] sm:$0xf]  ;;  %s316_s9 = sand.u32 1, %s803_s27  }
  0x23   : > { %v338_v8 = vld [vmem:[%s326_s21] sm:$0xf]  ;;  %v353_v9 = vsel %vm351_vm1, %v969_v7, 0  ;;  %s622_s12 = sshll.u32 %s316_s9, 3  ;;  %v502_v50 = vunpack.c.l.bf16 %v969_v7  ;;  %s519_s21 = scalar_lea.hbm %s1032_s7, %s634_s19 }
  0x24   : > { %457 = vperm.xlu0 %727, %v449_v5   ;;  %473 = vperm.xlu1 %728, %v465_v6   ;;  %v405_v10 = vsel %vm351_vm1, %v338_v8, 0  ;;  %s318_s23 = scalar_lea.vmem [#allocation3], %s622_s12  ;;  %s506_s13 = scalar_lea.sflag [#allocation4], %s316_s9 }
  0x25   : > { %642 = vmatpush3.bf16.msra.mxu0 %v353_v9  ;;  %648 = vmatpush3.bf16.msra.mxu1 %v405_v10  ;;  %s521_s24 = sshll.u32 %s318_s23, 4  ;;  %s522_s24 = int_to_ptr.vmem [resolvable:$true] %s521_s24 }
  0x26   : > { %s735_s22 = scalar_lea.vmem %s522_s24, 128  ;;  %p742_p4 = scmp.lt.s32.totalorder %s522_s24, %s740_s30 }
  0x27   : > { %p736_p0 = scmp.ne.s32.totalorder %s522_s24, %s735_s22  ;;  %p743_p5 = scmp.lt.s32.totalorder %s741_s11, %s735_s22 }
  0x28   : > { %488 = vperm.xlu0 %727, %v485_v13   ;;  %644 = vmatmul.mubr.msk.bf16.vlgmr.msra.gmra.mxu0 %vm347_vm2, %v729_v11 }
  0x29   : > { %650 = vmatmul.mubr.msk.bf16.vlgmr.msra.gmra.mxu1 %vm347_vm2, %v730_v12  ;;  %p737_p1 = pnand %p736_p0, %p927_p3  ;;  %p744_p6 = por %p743_p5, %p742_p4 }
  0x2b   : > { %p738_p2 = pneg %p737_p1 }
  0x2d   : > { %p745_p7 = pnand %p744_p6, %p738_p2 }
  0x9b   : > { %v453_v14 = vpop.permute.xlu0 %452  ;;  %v469_v21 = vpop.permute.xlu1 %468 }
  0x9f   : > { %v458_v24 = vpop.permute.xlu0 %457  ;;  %v474_v31 = vpop.permute.xlu1 %473 }
  0xa3   : > { %v489_v42 = vpop.permute.xlu0 %488 }
  0xa4   : > { %v494_v44 = vrot.slane %v489_v42, %v493_v40 }
  0xe8   : > { %v389_v15 = vpop.f32.mrf.mxu0 }
  0xe9   : > { %v441_v16 = vpop.f32.mrf.mxu1 }
  0xea   : > { %v442_v17 = vadd.f32 %v441_v16, %v389_v15  ;;  %v645_v18 = vpop.f32.mrf.mxu0 }
  0xeb   : > { %v651_v19 = vpop.f32.mrf.mxu1 }
  0xec   : > { %v460_v20 = vadd.f32 %v453_v14, %v442_v17  ;;  %v392_v22 = vpop.f32.mrf.mxu0 }
  0xed   : > { %v444_v23 = vpop.f32.mrf.mxu1 }
  0xee   : > { %v445_v25 = vadd.f32 %v444_v23, %v392_v22  ;;  %v646_v26 = vpop.f32.mrf.mxu0  ;;  %v462_v28 = vmax.f32 %v460_v20, 0.0 }
  0xef   : > { %v652_v27 = vpop.f32.mrf.mxu1 }
  0xf0   : > { %v461_v29 = vadd.f32 %v458_v24, %v445_v25  ;;  %v476_v32 = vmul.f32 %v469_v21, %v462_v28 }
  0xf2   : > { %v463_v30 = vmax.f32 %v461_v29, 0.0 }
  0xf4   : > { %v477_v33 = vmul.f32 %v474_v31, %v463_v30 }
  0xf6   : > { %v478_v35 = vadd.f32 %v477_v33, %v476_v32 }
  0xf8   : > { %v479_v36 = vrot.slane %v478_v35, 4 }
  0xfa   : > { %v480_v38 = vadd.f32 %v479_v36, %v478_v35 }
  0xfc   : > { %v481_v39 = vrot.slane %v480_v38, 2 }
  0xfe   : > { %v482_v41 = vadd.f32 %v481_v39, %v480_v38 }
 0x100   : > { %v483_v43 = vrot.slane %v482_v41, 1 }
 0x102   : > { %v484_v45 = vadd.f32 %v483_v43, %v482_v41 }
 0x104   : > { %v495_v46 = vadd.f32 %v494_v44, %v484_v45 }
 0x106   : > { %v631_v47 = vmul.f32 -1.442695, %v495_v46 }
 0x108   : > { %731 = vpow2.f32 %v631_v47 }
 0x115   : > { %v732_v48 = vpop.eup %731 }
 0x116   : > { %v499_v49 = vadd.f32 1.0, %v732_v48 }
 0x118   : > { %733 = vrcp.f32 %v499_v49 }
 0x125   : > { %v734_v51 = vpop.eup %733 }
 0x126   : > { %v503_v52 = vmul.f32 %v734_v51, %v502_v50 }
 0x128   : > { %504 = vst [vmem:[%s318_s23] sm:$0xff] %v503_v52 }
 0x129   : > { %748 = shalt.err (!%p745_p7)
}
 0x12a   : > { %s749_s14 = scalar_lea.hbm %s519_s21, 128  ;;  %s753_s17 = scalar_lea.hbm %s1032_s7, 512 }
 0x12b   : > { %p750_p9 = scmp.ne.s32.totalorder %s519_s21, %s749_s14  ;;  %p754_p12 = scmp.lt.s32.totalorder %s519_s21, %s1032_s7 }
 0x12c   : > { %p755_p13 = scmp.lt.s32.totalorder %s753_s17, %s749_s14 }
 0x12d   : > { %p751_p10 = pnand %p750_p9, %p927_p3 }
 0x12e   : > { %p756_p0 = por %p755_p13, %p754_p12 }
 0x12f   : > { %p752_p11 = pneg %p751_p10 }
 0x131   : > { %p757_p1 = pnand %p756_p0, %p752_p11 }
 0x133   : > { %760 = shalt.err (!%p757_p1)
}
 0x134   : > { %653 = dma.vmem_to_hbm [thread:$0]  (%p927_p3), %s522_s24, 128, %s519_s21, %s506_s13  }
 0x135 PF: > { %p659_p2 = scmp.ge.s32.totalorder %s827_s10, 2  ;;  %s533_s23 = sand.u32 1, %s799_s26  }
 0x136   : > { %s534_s25 = scalar_lea.sflag [#allocation4], %s533_s23 }
 0x137   : > { %p656_p4 = pnand %p659_p2, %p936_p8 }
 0x139   : > { %p657_p5 = pneg %p656_p4 }
 0x13b   : > { %794 = dma.done.wait (%p657_p5), %s534_s25, 128  }
 0x13c   : > { %796 = vsyncadd (%p657_p5), %s534_s25, 4294967168  ;;  %s22_s10 = sadd.s32 1, %s827_s10   ;;  %s1041_s30 = sld [smem:[#allocation6_spill]] }
 0x13d   : > { %p19_p6 = scmp.ge.s32.totalorder %s22_s10, 6   ;;  %s1042_s15 = sld [smem:[#allocation7_spill]] }
 0x13e   : > { %s1043_s9 = sld [smem:[#allocation8_spill]]  ;;  %s1044_s26 = smov %s803_s27 }
 0x13f   : > { %s1045_s27 = smov %s807_s28  ;;  %s1046_s28 = smov %s945_s20 }
 0x140   : > { %s1047_s29 = smov %s819_s8  ;;  %21 = sbr.rel (!%p19_p6) target bundleno = 8 (0x8), region = 86 }
 0x143   : > { %s1048_s8 = smov %s1042_s15 }
 0x145   :  { %539 = vsyncpa [#allocation4], 1 }
 0x146   :  { %541 = vsyncpa [#allocation4 + $0x1], 1 }

</bundles_post_ra>
